<compile_context>
chip_gen: v5e
topology: v5e:2x2
jax: 0.10.0
libtpu: 0.0.40
codegen_flags: <defaults>
</compile_context>

<pallas_src>
import functools

import numpy as np
import jax
import jax.numpy as jnp
from jax.experimental import pallas as pl
from jax.experimental.pallas import tpu as pltpu


# ----------------------------------------------------------------------------
# micrograd's deterministic RNG (xorshift*), so weights match RNG(50) exactly.
# ----------------------------------------------------------------------------
class RNG:
    def __init__(self, seed):
        self.state = seed

    def random_u32(self):
        self.state ^= (self.state >> 12) & 0xFFFFFFFFFFFFFFFF
        self.state ^= (self.state << 25) & 0xFFFFFFFFFFFFFFFF
        self.state ^= (self.state >> 27) & 0xFFFFFFFFFFFFFFFF
        return ((self.state * 0x2545F4914F6CDD1D) >> 32) & 0xFFFFFFFF

    def random(self):
        return (self.random_u32() >> 8) / 16777216.0

    def uniform(self, a=-1.0, b=1.0):
        return a + (b - a) * self.random()


def _round_up(x, m):
    return ((x + m - 1) // m) * m


def _choose_tile_b(B, block_b=512):
    """Sublane-aligned batch tile: >=2 grid steps when B is large (v7x megacore),
    while keeping batch-padding waste small."""
    B8 = _round_up(max(B, 1), 8)
    if B8 <= 8:
        return 8
    tb = max(8, min(_round_up(block_b, 8), _round_up(pl.cdiv(B8, 2), 8)))
    # Cap padding waste at ~12.5% of B.
    while tb > 8 and (_round_up(B, tb) - B) * 8 > B:
        tb -= 8
    return tb


# ----------------------------------------------------------------------------
# Pallas kernel: MXU dot + in-kernel bias add + tanh epilogue (f32 accumulate).
# ----------------------------------------------------------------------------
def layer_kernel(x_ref, w_ref, b_ref, o_ref):
    # x_ref: (TB, nin), w_ref: (nin, N_pad), b_ref: (1, N_pad), o_ref: (TB, N_pad)
    acc = jnp.dot(x_ref[...], w_ref[...], preferred_element_type=jnp.float32)
    o_ref[...] = jnp.tanh(acc + b_ref[...]).astype(o_ref.dtype)


@functools.lru_cache(maxsize=None)
def _build_call(TB, n_steps, nin, N_pad, single_buffer_w, x_dtype_name):
    B_pad = TB * n_steps
    x_dtype = jnp.dtype(x_dtype_name)
    const_kwargs = dict(pipeline_mode=pl.Buffered(1)) if single_buffer_w else {}

    in_specs = [
        pl.BlockSpec((TB, nin), lambda i: (i, 0),
                     memory_space=pltpu.MemorySpace.VMEM),
        pl.BlockSpec((nin, N_pad), lambda i: (0, 0),
                     memory_space=pltpu.MemorySpace.VMEM, **const_kwargs),
        pl.BlockSpec((1, N_pad), lambda i: (0, 0),
                     memory_space=pltpu.MemorySpace.VMEM, **const_kwargs),
    ]
    out_spec = pl.BlockSpec((TB, N_pad), lambda i: (i, 0),
                            memory_space=pltpu.MemorySpace.VMEM)

    # VMEM budget guard (v7x has only 64 MiB physical VMEM).
    itemsize = x_dtype.itemsize
    bufs_w = 1 if single_buffer_w else 2
    vmem_est = (2 * TB * nin * itemsize
                + bufs_w * nin * N_pad * itemsize
                + bufs_w * N_pad * 4
                + 2 * TB * N_pad * 4)
    vmem_limit = int(min(64 * 2**20, max(16 * 2**20, 4 * vmem_est)))

    cost = pl.CostEstimate(
        flops=2 * B_pad * nin * N_pad,
        transcendentals=B_pad * N_pad,
        bytes_accessed=(B_pad * nin * itemsize + nin * N_pad * itemsize
                        + N_pad * 4 + B_pad * N_pad * 4),
    )

    return pl.pallas_call(
        layer_kernel,
        out_shape=jax.ShapeDtypeStruct((B_pad, N_pad), jnp.float32),
        grid=(n_steps,),
        in_specs=in_specs,
        out_specs=out_spec,
        compiler_params=pltpu.CompilerParams(
            dimension_semantics=("parallel",),
            vmem_limit_bytes=vmem_limit),
        cost_estimate=cost,
    )


# ----------------------------------------------------------------------------
# One-time parameter preparation (hoisted out of the forward pass).
# ----------------------------------------------------------------------------
def prepare_layer_params(W, b):
    """Pad W (nin, nout) / b (nout,) once to a lane-dense N_pad (multiple of 128)."""
    nin, nout = W.shape
    N_pad = _round_up(max(nout, 1), 128)
    W_pad = jnp.zeros((nin, N_pad), jnp.float32).at[:, :nout].set(
        W.astype(jnp.float32))
    b_pad = jnp.zeros((1, N_pad), jnp.float32).at[0, :nout].set(
        b.astype(jnp.float32).reshape(nout))
    return W_pad, b_pad, nout


def layer_forward_batched(x, W_pad, b_pad, nout, *, block_b=512,
                          compute_dtype=jnp.float32, slice_output=True):
    """Batched Layer forward: x (B, nin) -> (B, nout) = tanh(x @ W + b).
    W_pad / b_pad come from prepare_layer_params (padded once, reused)."""
    B, nin = x.shape
    N_pad = W_pad.shape[1]

    TB = _choose_tile_b(B, block_b)
    B_pad = _round_up(B, TB)
    n_steps = B_pad // TB

    x_c = x.astype(compute_dtype)
    W_c = W_pad.astype(compute_dtype)
    if B_pad != B:
        x_c = jnp.pad(x_c, ((0, B_pad - B), (0, 0)))  # batch-only padding

    dtype_name = jnp.dtype(compute_dtype).name
    try:
        # Single-buffer the constant W / bias tiles (never re-fetched).
        call = _build_call(TB, n_steps, nin, N_pad, True, dtype_name)
        out = call(x_c, W_c, b_pad)
    except Exception:
        # Fallback: default (double) buffering on all operands.
        call = _build_call(TB, n_steps, nin, N_pad, False, dtype_name)
        out = call(x_c, W_c, b_pad)

    if slice_output and (B_pad != B or N_pad != nout):
        out = out[:B, :nout]
    return out


def layer_forward(x, W_pad, b_pad, nout, **kwargs):
    """Single-vector forward matching the PyTorch module exactly:
    x (nin,) -> (1, nout) == torch.stack([tanh(sum(w_i*x) + b_i)], dim=-1)."""
    nin = x.shape[0]
    return layer_forward_batched(x.reshape(1, nin), W_pad, b_pad, nout, **kwargs)


def make_layer_params(nin, nout, seed=50):
    """Deterministic parameter init matching Layer/Neuron __init__ draw order."""
    rng = RNG(seed)
    W_rows = []
    for _ in range(nout):                 # one Neuron at a time
        W_rows.append([rng.uniform(-1, 1) * nin ** (-0.5) for _ in range(nin)])
    W = jnp.asarray(np.asarray(W_rows, dtype=np.float32).T)   # (nin, nout)
    b = jnp.zeros((nout,), dtype=jnp.float32)                  # each neuron: zeros(1)
    return W, b


if __name__ == "__main__":
    nin, nout, batch = 32, 8, 16

    # One-time init: raw params (RNG(50) draw order) + hoisted padded operands.
    W, b = make_layer_params(nin, nout)
    W_pad, b_pad, _ = prepare_layer_params(W, b)

    key = jax.random.PRNGKey(0)
    xb = jax.random.normal(key, (batch, nin), dtype=jnp.float32)

    # Batched path (each row is one Layer.forward application).
    out_b = jax.block_until_ready(layer_forward_batched(xb, W_pad, b_pad, nout))
    ref_b = jnp.tanh(xb @ W + b[None, :])
    assert out_b.shape == (batch, nout)
    np.testing.assert_allclose(np.asarray(out_b), np.asarray(ref_b),
                               rtol=1e-5, atol=1e-5)

    # Single-vector path: exact module semantics, output shape (1, nout).
    out_1 = jax.block_until_ready(layer_forward(xb[0], W_pad, b_pad, nout))
    ref_1 = jnp.tanh(xb[0].reshape(1, nin) @ W + b[None, :])
    assert out_1.shape == (1, nout)
    np.testing.assert_allclose(np.asarray(out_1), np.asarray(ref_1),
                               rtol=1e-5, atol=1e-5)

    print("KERNEL_OK")
</pallas_src>

<mosaic_0001>
module attributes {stable_mosaic.version = 11 : i64} {
  func.func @layer_kernel(%arg0: i32, %arg1: memref<8x32xf32, #tpu.memory_space<vmem>>, %arg2: memref<32x128xf32, #tpu.memory_space<vmem>>, %arg3: memref<1x128xf32, #tpu.memory_space<vmem>>, %arg4: memref<8x128xf32, #tpu.memory_space<vmem>>) attributes {dimension_semantics = [#tpu.dimension_semantics<parallel>], iteration_bounds = array<i64: 2>, scalar_prefetch = 0 : i64, scratch_operands = 0 : i64, tpu.core_type = #tpu.core_type<tc>, window_params = [{transform_indices = @transform_0, window_bounds = array<i64: 8, 32>}, {pipeline_mode = #tpu.pipeline_mode<synchronous>, transform_indices = @transform_1, window_bounds = array<i64: 32, 128>}, {pipeline_mode = #tpu.pipeline_mode<synchronous>, transform_indices = @transform_2, window_bounds = array<i64: 1, 128>}, {transform_indices = @transform_3, window_bounds = array<i64: 8, 128>}]} {
    %c0 = arith.constant 0 : index
    %c0_0 = arith.constant 0 : index
    %0 = vector.load %arg1[%c0, %c0_0] : memref<8x32xf32, #tpu.memory_space<vmem>>, vector<8x32xf32>
    %c0_1 = arith.constant 0 : index
    %c0_2 = arith.constant 0 : index
    %1 = vector.load %arg2[%c0_1, %c0_2] : memref<32x128xf32, #tpu.memory_space<vmem>>, vector<32x128xf32>
    %cst = arith.constant dense<0.000000e+00> : vector<8x128xf32>
    %2 = tpu.matmul %0, %1, %cst {dimension_numbers = #tpu.dot_dimension_numbers<[1], [0], [0], [1], [0, 0, 1, 1], [], []>} : vector<8x32xf32>, vector<32x128xf32>, vector<8x128xf32> -> vector<8x128xf32>
    %c0_3 = arith.constant 0 : index
    %c0_4 = arith.constant 0 : index
    %3 = vector.load %arg3[%c0_3, %c0_4] : memref<1x128xf32, #tpu.memory_space<vmem>>, vector<1x128xf32>
    %4 = vector.broadcast %3 : vector<1x128xf32> to vector<8x128xf32>
    %5 = arith.addf %2, %4 : vector<8x128xf32>
    %6 = math.tanh %5 : vector<8x128xf32>
    %c0_5 = arith.constant 0 : index
    %c0_6 = arith.constant 0 : index
    %7 = vector.load %arg4[%c0_5, %c0_6] : memref<8x128xf32, #tpu.memory_space<vmem>>, vector<8x128xf32>
    tpu.vector_store %arg4[%c0_5, %c0_6], %6 {strides = array<i32>} : memref<8x128xf32, #tpu.memory_space<vmem>>, vector<8x128xf32>,
    return
  }
  func.func @transform_0(%arg0: i32) -> (i32, i32) {
    %c0_i32 = arith.constant 0 : i32
    %c0_i32_0 = arith.constant 0 : i32
    return %arg0, %c0_i32 : i32, i32
  }
  func.func @transform_1(%arg0: i32) -> (i32, i32) {
    %c0_i32 = arith.constant 0 : i32
    %c0_i32_0 = arith.constant 0 : i32
    %c0_i32_1 = arith.constant 0 : i32
    return %c0_i32, %c0_i32_0 : i32, i32
  }
  func.func @transform_2(%arg0: i32) -> (i32, i32) {
    %c0_i32 = arith.constant 0 : i32
    %c0_i32_0 = arith.constant 0 : i32
    %c0_i32_1 = arith.constant 0 : i32
    return %c0_i32, %c0_i32_0 : i32, i32
  }
  func.func @transform_3(%arg0: i32) -> (i32, i32) {
    %c0_i32 = arith.constant 0 : i32
    %c0_i32_0 = arith.constant 0 : i32
    return %arg0, %c0_i32 : i32, i32
  }
}

module attributes {stable_mosaic.version = 11 : i64} {
  func.func @layer_kernel(%arg0: i32, %arg1: memref<8x32xf32, #tpu.memory_space<vmem>>, %arg2: memref<32x128xf32, #tpu.memory_space<vmem>>, %arg3: memref<1x128xf32, #tpu.memory_space<vmem>>, %arg4: memref<8x128xf32, #tpu.memory_space<vmem>>) attributes {dimension_semantics = [#tpu.dimension_semantics<parallel>], iteration_bounds = array<i64: 2>, scalar_prefetch = 0 : i64, scratch_operands = 0 : i64, tpu.core_type = #tpu.core_type<tc>, window_params = [{transform_indices = @transform_0, window_bounds = array<i64: 8, 32>}, {pipeline_mode = #tpu.pipeline_mode<synchronous>, transform_indices = @transform_1, window_bounds = array<i64: 32, 128>}, {pipeline_mode = #tpu.pipeline_mode<synchronous>, transform_indices = @transform_2, window_bounds = array<i64: 1, 128>}, {transform_indices = @transform_3, window_bounds = array<i64: 8, 128>}]} {
    %c0 = arith.constant 0 : index
    %c0_0 = arith.constant 0 : index
    %0 = vector.load %arg1[%c0, %c0_0] : memref<8x32xf32, #tpu.memory_space<vmem>>, vector<8x32xf32>
    %c0_1 = arith.constant 0 : index
    %c0_2 = arith.constant 0 : index
    %1 = vector.load %arg2[%c0_1, %c0_2] : memref<32x128xf32, #tpu.memory_space<vmem>>, vector<32x128xf32>
    %cst = arith.constant dense<0.000000e+00> : vector<8x128xf32>
    %2 = tpu.matmul %0, %1, %cst {dimension_numbers = #tpu.dot_dimension_numbers<[1], [0], [0], [1], [0, 0, 1, 1], [], []>} : vector<8x32xf32>, vector<32x128xf32>, vector<8x128xf32> -> vector<8x128xf32>
    %c0_3 = arith.constant 0 : index
    %c0_4 = arith.constant 0 : index
    %3 = vector.load %arg3[%c0_3, %c0_4] : memref<1x128xf32, #tpu.memory_space<vmem>>, vector<1x128xf32>
    %4 = vector.broadcast %3 : vector<1x128xf32> to vector<8x128xf32>
    %5 = arith.addf %2, %4 : vector<8x128xf32>
    %6 = math.tanh %5 : vector<8x128xf32>
    %c0_5 = arith.constant 0 : index
    %c0_6 = arith.constant 0 : index
    %7 = vector.load %arg4[%c0_5, %c0_6] : memref<8x128xf32, #tpu.memory_space<vmem>>, vector<8x128xf32>
    tpu.vector_store %arg4[%c0_5, %c0_6], %6 {strides = array<i32>} : memref<8x128xf32, #tpu.memory_space<vmem>>, vector<8x128xf32>,
    return
  }
  func.func @transform_0(%arg0: i32) -> (i32, i32) {
    %c0_i32 = arith.constant 0 : i32
    %c0_i32_0 = arith.constant 0 : i32
    return %arg0, %c0_i32 : i32, i32
  }
  func.func @transform_1(%arg0: i32) -> (i32, i32) {
    %c0_i32 = arith.constant 0 : i32
    %c0_i32_0 = arith.constant 0 : i32
    %c0_i32_1 = arith.constant 0 : i32
    return %c0_i32, %c0_i32_0 : i32, i32
  }
  func.func @transform_2(%arg0: i32) -> (i32, i32) {
    %c0_i32 = arith.constant 0 : i32
    %c0_i32_0 = arith.constant 0 : i32
    %c0_i32_1 = arith.constant 0 : i32
    return %c0_i32, %c0_i32_0 : i32, i32
  }
  func.func @transform_3(%arg0: i32) -> (i32, i32) {
    %c0_i32 = arith.constant 0 : i32
    %c0_i32_0 = arith.constant 0 : i32
    return %arg0, %c0_i32 : i32, i32
  }
}

</mosaic_0001>

<bundles_post_ra>
// kernel: tpu_custom_call.1
= control target key start
LH: loop header
LB: loop body
LE: loop exit
PB: predicated region body
PF: predicated region fallthrough
CT: control target
= control target key end

     0   :  { %8 = vsyncpa [#allocation3], 0  ;;  %s707_s0 = inlined_call_operand.hbm [shape: f32[16,32], index: 0, kind: input, shape index: {}]   ;;  %s708_s1 = inlined_call_operand.hbm [shape: f32[32,128], index: 1, kind: input, shape index: {}]   ;;  %s709_s2 = inlined_call_operand.vmem [shape: f32[1,128], index: 2, kind: input, shape index: {}]   ;;  %s710_s3 = inlined_call_operand.hbm [shape: f32[16,128], index: 3, kind: output, shape index: {}]  }
   0x1   :  { %10 = vsyncpa [#allocation3 + $0x1], 0 }
   0x2   :  { %11 = vsyncpa [#allocation6], 0 }
   0x3   :  { %12 = vsyncpa [#allocation4], 0 }
   0x4   :  { %14 = vsyncpa [#allocation4 + $0x1], 0  ;;  %s568_s12 = smov 0   ;;  %s570_s13 = smov 0  }
   0x5   :  { %s572_s14 = smov 0   ;;  %s574_s15 = smov 0  }
   0x6 LB: > { %s130_s18 = sshll.u32 %s708_s1, 4  ;;  %s592_s19 = sadd.s32 4294967295, %s543_s15   ;;  %s543_s15 = sphi %s574_s15, %s720_s15   ;;  %s539_s14 = sphi %s572_s14, %s719_s14   ;;  %s535_s13 = sphi %s570_s13, %s718_s13   ;;  %s531_s12 = sphi %s568_s12, %s717_s12   ;;  %s131_s18 = int_to_ptr.hbm [resolvable:$true] %s130_s18 }
   0x7   : > { %p337_p0 = scmp.ge.s32.totalorder %s543_s15, 1  ;;  %p41_p1 = scmp.eq.s32.totalorder %s592_s19, 0 }
   0x8   : > { %p119_p2 = scmp.lt.s32.totalorder %s543_s15, 3  ;;  %s545_s21 = smov [#allocation5]  }
   0x9   : > { %s132_s22 = sshll.u32 %s545_s21, 4  ;;  %s546_s23 = smov 128   ;;  %s133_s22 = int_to_ptr.vmem [resolvable:$true] %s132_s22 }
   0xa   : > { %p597_p3 = pnand %p337_p0, %p119_p2  ;;  %s547_s24 = smov 8  }
   0xb   : > { %s336_s25 = sadd.s32 4294967294, %s543_s15   ;;  %s608_s26 = sadd.s32 1, %s543_s15  }
   0xc   : > { %p359_p4 = pneg %p597_p3  ;;  %s27_s27 = sadd.s32 1, %s539_s14 }
   0xd   : > { %s24_s28 = ssub.s32 %s543_s15, %s608_s26  ;;  %p34_p7 = scmp.ne.s32.totalorder %s539_s14, %s535_s13 }
   0xe   : > { %p360_p6 = pnand %p359_p4, %p41_p1  ;;  %p25_p8 = scmp.eq.s32.totalorder %s24_s28, 0 }
   0xf   : > { %p35_p9 = scmp.eq.s32.totalorder %s543_s15, 0  ;;  %p40_p10 = scmp.ne.s32.totalorder %s535_s13, %s531_s12 }
  0x10   : > { %362 = dma.hbm_to_vmem [thread:$0]  (!%p360_p6), %s131_s18, 512, %s133_s22, [#allocation6], %s546_s23, %s546_s23, %s547_s24  }
  0x11   : > { %p106_p11 = scmp.eq.s32.totalorder %s592_s19, 1  ;;  %p624_p12 = por %p41_p1, %p40_p10 }
  0x12   : > { %s620_s29 = scalar_select %p25_p8, %s539_s14, %s27_s27  }
  0x13   : > { %p628_p13 = por %p106_p11, %p34_p7  ;;  %p112_p0 = scmp.eq.s32.totalorder %s336_s25, 1 }
  0x14   : > { %p36_p2 = por %p35_p9, %p34_p7  ;;  %s149_s5 = sand.u32 1, %s539_s14  }
  0x15   : > { %p633_p4 = por %p112_p0, %p40_p10  ;;  %p372_p6 = scmp.lt.s32.totalorder %s543_s15, 2 }
  0x16   : > { %s340_s7 = sshll.u32 %s149_s5, 3  ;;  %s341_s8 = sshll.u32 %s543_s15, 3 }
  0x17   : > { %s157_s11 = scalar_lea.hbm %s707_s0, %s341_s8  ;;  %s153_s17 = scalar_lea.vmem [#allocation2], %s340_s7 }
  0x18   : > { %s159_s16 = sshll.u32 %s157_s11, 4  ;;  %s161_s18 = sshll.u32 %s153_s17, 4  ;;  %s160_s16 = int_to_ptr.hbm [resolvable:$true] %s159_s16  ;;  %s162_s18 = int_to_ptr.vmem [resolvable:$true] %s161_s18 }
  0x19   : > { %p642_p8 = pnand %p372_p6, %p36_p2  ;;  %s150_s22 = scalar_lea.sflag [#allocation3], %s149_s5 }
  0x1a   : > { %s443_s23 = sshra.s32 %s160_s16, 4  ;;  %s450_s28 = scalar_lea.hbm %s707_s0, 16  ;;  %s444_s23 = int_to_ptr.hbm [resolvable:$true] %s443_s23 }
  0x1b   : > { %s445_s24 = scalar_lea.hbm %s444_s23, 8  ;;  %p447_p9 = pneg %p642_p8 }
  0x1c   : > { %p446_p7 = scmp.ne.s32.totalorder %s444_s23, %s445_s24  ;;  %p451_p0 = scmp.lt.s32.totalorder %s444_s23, %s707_s0 }
  0x1d   : > { %p452_p2 = scmp.lt.s32.totalorder %s450_s28, %s445_s24 }
  0x1e   : > { %p448_p10 = pnand %p447_p9, %p446_p7 }
  0x1f   : > { %p453_p6 = por %p452_p2, %p451_p0 }
  0x20   : > { %p449_p11 = pneg %p448_p10 }
  0x22   : > { %p454_p5 = pnand %p453_p6, %p449_p11 }
  0x24   : > { %457 = shalt.err (!%p454_p5)
}
  0x25   : > { %366 = dma.hbm_to_vmem [thread:$0]  (!%p642_p8), %s160_s16, 128, %s162_s18, %s150_s22  }
  0x26   : > { %170 = sbr.rel (%p597_p3) target bundleno = 192 (0xc0), region = 32  ;;  %s659_s5 = sand.u32 (!%p597_p3), 1, %s535_s13  }
  0x27   : > { %s343_s9 = sshll.u32 (!%p597_p3), %s659_s5, 3  ;;  %s173_s10 = scalar_lea.sflag (!%p597_p3), [#allocation3], %s659_s5 }
  0x28   : > { %s176_s11 = scalar_lea.vmem (!%p597_p3), [#allocation2], %s343_s9 }
  0x2b   : > { %518 = dma.done.wait (%p624_p12), %s173_s10, 128  }
  0x2c   : > { %520 = vsyncadd (%p624_p12), %s173_s10, 4294967168 }
  0x2d   : > { %522 = dma.done.wait (%p41_p1), [#allocation6], 512  }
  0x2e   : > { %524 = vsyncadd (%p41_p1), [#allocation6], 4294966784  ;;  %v209_v0 = vld [vmem:[#allocation5 + $0x18] sm:$0xff]  ;;  %v208_v1 = vld [vmem:[#allocation5 + $0x10] sm:$0xff]  ;;  %vm214_vm0 = vcmask 261120   ;;  %s348_s16 = sshll.u32 %s592_s19, 3 }
  0x2f   : > { %230 = vmatpush.msra.mxu0 %v209_v0  ;;  %v207_v2 = vld [vmem:[#allocation5 + $0x8] sm:$0xff]  ;;  %v206_v3 = vld [vmem:[#allocation5] sm:$0xff]  ;;  %v205_v4 = vld [vmem:[%s176_s11] sm:$0xff]  ;;  %s251_s21 = scalar_lea.hbm %s710_s3, %s348_s16  ;;  %s204_s22 = scalar_lea.vmem [#allocation7], %s343_s9 }
  0x30   : > { %v410_v5 = vld [vmem:[%s709_s2] ss:$0 sm:$0xff]  ;;  %s253_s23 = sshll.u32 %s204_s22, 4  ;;  %s255_s24 = sshll.u32 %s251_s21, 4  ;;  %s254_s23 = int_to_ptr.vmem [resolvable:$true] %s253_s23  ;;  %s256_s24 = int_to_ptr.hbm [resolvable:$true] %s255_s24 }
  0x31   : > { %231 = vmatpush.msra.mxu0 %v208_v1  ;;  %s241_s25 = scalar_lea.sflag [#allocation4], %s659_s5  ;;  %s487_s27 = sshra.s32 %s256_s24, 4  ;;  %s488_s27 = int_to_ptr.hbm [resolvable:$true] %s487_s27 }
  0x32   : > { %s489_s28 = scalar_lea.hbm %s488_s27, 8  ;;  %s493_s8 = scalar_lea.hbm %s710_s3, 16 }
  0x33   : > { %232 = vmatpush.msra.mxu0 %v207_v2  ;;  %p490_p1 = scmp.ne.s32.totalorder %s488_s27, %s489_s28  ;;  %p494_p12 = scmp.lt.s32.totalorder %s488_s27, %s710_s3 }
  0x34   : > { %p495_p8 = scmp.lt.s32.totalorder %s493_s8, %s489_s28 }
  0x35   : > { %233 = vmatpush.msra.mxu0 %v206_v3  ;;  %p491_p3 = pnand %p490_p1, %p628_p13 }
  0x36   : > { %346 = vmatmul.msk.f32.vlgmr.msra.gmra.mxu0 %vm214_vm0, %v205_v4  ;;  %p496_p7 = por %p495_p8, %p494_p12 }
  0x37   : > { %p492_p5 = pneg %p491_p3 }
  0x39   : > { %p497_p9 = pnand %p496_p7, %p492_p5 }
  0xb3   : > { %v235_v6 = vpop.f32.mrf.mxu0 }
  0xb4   : > { %v236_v7 = vadd.f32 %v410_v5, %v235_v6 }
  0xb6   : > { %411 = vtanh.f32 %v236_v7 }
  0xbc   : > { %v412_v8 = vpop.eup %411 }
  0xbd   : > { %239 = vst [vmem:[%s204_s22] sm:$0xff] %v412_v8 }
  0xbe   : > { %500 = shalt.err (!%p497_p9)
}
  0xbf   : > { %357 = dma.vmem_to_hbm [thread:$0]  (%p628_p13), %s254_s23, 128, %s256_s24, %s241_s25  }
  0xc0 PF: > { %s267_s5 = sand.u32 1, %s531_s12   ;;  %p716_p10 = scmp.ge.s32.totalorder %s543_s15, 2 }
  0xc1   : > { %s268_s11 = scalar_lea.sflag [#allocation4], %s267_s5 }
  0xc2   : > { %p368_p11 = pnand %p716_p10, %p633_p4 }
  0xc4   : > { %p369_p0 = pneg %p368_p11 }
  0xc6   : > { %526 = dma.done.wait (%p369_p0), %s268_s11, 128  }
  0xc7   : > { %528 = vsyncadd (%p369_p0), %s268_s11, 4294967168  ;;  %p17_p2 = scmp.ge.s32.totalorder %s608_s26, 4   ;;  %s717_s12 = smov %s535_s13 }
  0xc8   : > { %s718_s13 = smov %s539_s14  ;;  %s719_s14 = smov %s620_s29 }
  0xc9   : > { %s720_s15 = smov %s608_s26  ;;  %19 = sbr.rel (!%p17_p2) target bundleno = 6 (0x6), region = 81 }
  0xce   :  { %274 = vsyncpa [#allocation3], 1 }
  0xcf   :  { %276 = vsyncpa [#allocation3 + $0x1], 1 }
  0xd0   :  { %277 = vsyncpa [#allocation6], 1 }
  0xd1   :  { %278 = vsyncpa [#allocation4], 1 }
  0xd2   :  { %280 = vsyncpa [#allocation4 + $0x1], 1 }

// kernel: tpu_custom_call.1
= control target key start
LH: loop header
LB: loop body
LE: loop exit
PB: predicated region body
PF: predicated region fallthrough
CT: control target
= control target key end

     0   :  { %8 = vsyncpa [#allocation3], 0  ;;  %s707_s0 = inlined_call_operand.hbm [shape: f32[16,32], index: 0, kind: input, shape index: {}]   ;;  %s708_s1 = inlined_call_operand.hbm [shape: f32[32,128], index: 1, kind: input, shape index: {}]   ;;  %s709_s2 = inlined_call_operand.vmem [shape: f32[1,128], index: 2, kind: input, shape index: {}]   ;;  %s710_s3 = inlined_call_operand.hbm [shape: f32[16,128], index: 3, kind: output, shape index: {}]  }
   0x1   :  { %10 = vsyncpa [#allocation3 + $0x1], 0 }
   0x2   :  { %11 = vsyncpa [#allocation6], 0 }
   0x3   :  { %12 = vsyncpa [#allocation4], 0 }
   0x4   :  { %14 = vsyncpa [#allocation4 + $0x1], 0  ;;  %s568_s12 = smov 0   ;;  %s570_s13 = smov 0  }
   0x5   :  { %s572_s14 = smov 0   ;;  %s574_s15 = smov 0  }
   0x6 LB: > { %s130_s18 = sshll.u32 %s708_s1, 4  ;;  %s592_s19 = sadd.s32 4294967295, %s543_s15   ;;  %s543_s15 = sphi %s574_s15, %s720_s15   ;;  %s539_s14 = sphi %s572_s14, %s719_s14   ;;  %s535_s13 = sphi %s570_s13, %s718_s13   ;;  %s531_s12 = sphi %s568_s12, %s717_s12   ;;  %s131_s18 = int_to_ptr.hbm [resolvable:$true] %s130_s18 }
   0x7   : > { %p337_p0 = scmp.ge.s32.totalorder %s543_s15, 1  ;;  %p41_p1 = scmp.eq.s32.totalorder %s592_s19, 0 }
   0x8   : > { %p119_p2 = scmp.lt.s32.totalorder %s543_s15, 3  ;;  %s545_s21 = smov [#allocation5]  }
   0x9   : > { %s132_s22 = sshll.u32 %s545_s21, 4  ;;  %s546_s23 = smov 128   ;;  %s133_s22 = int_to_ptr.vmem [resolvable:$true] %s132_s22 }
   0xa   : > { %p597_p3 = pnand %p337_p0, %p119_p2  ;;  %s547_s24 = smov 8  }
   0xb   : > { %s336_s25 = sadd.s32 4294967294, %s543_s15   ;;  %s608_s26 = sadd.s32 1, %s543_s15  }
   0xc   : > { %p359_p4 = pneg %p597_p3  ;;  %s27_s27 = sadd.s32 1, %s539_s14 }
   0xd   : > { %s24_s28 = ssub.s32 %s543_s15, %s608_s26  ;;  %p34_p7 = scmp.ne.s32.totalorder %s539_s14, %s535_s13 }
   0xe   : > { %p360_p6 = pnand %p359_p4, %p41_p1  ;;  %p25_p8 = scmp.eq.s32.totalorder %s24_s28, 0 }
   0xf   : > { %p35_p9 = scmp.eq.s32.totalorder %s543_s15, 0  ;;  %p40_p10 = scmp.ne.s32.totalorder %s535_s13, %s531_s12 }
  0x10   : > { %362 = dma.hbm_to_vmem [thread:$0]  (!%p360_p6), %s131_s18, 512, %s133_s22, [#allocation6], %s546_s23, %s546_s23, %s547_s24  }
  0x11   : > { %p106_p11 = scmp.eq.s32.totalorder %s592_s19, 1  ;;  %p624_p12 = por %p41_p1, %p40_p10 }
  0x12   : > { %s620_s29 = scalar_select %p25_p8, %s539_s14, %s27_s27  }
  0x13   : > { %p628_p13 = por %p106_p11, %p34_p7  ;;  %p112_p0 = scmp.eq.s32.totalorder %s336_s25, 1 }
  0x14   : > { %p36_p2 = por %p35_p9, %p34_p7  ;;  %s149_s5 = sand.u32 1, %s539_s14  }
  0x15   : > { %p633_p4 = por %p112_p0, %p40_p10  ;;  %p372_p6 = scmp.lt.s32.totalorder %s543_s15, 2 }
  0x16   : > { %s340_s7 = sshll.u32 %s149_s5, 3  ;;  %s341_s8 = sshll.u32 %s543_s15, 3 }
  0x17   : > { %s157_s11 = scalar_lea.hbm %s707_s0, %s341_s8  ;;  %s153_s17 = scalar_lea.vmem [#allocation2], %s340_s7 }
  0x18   : > { %s159_s16 = sshll.u32 %s157_s11, 4  ;;  %s161_s18 = sshll.u32 %s153_s17, 4  ;;  %s160_s16 = int_to_ptr.hbm [resolvable:$true] %s159_s16  ;;  %s162_s18 = int_to_ptr.vmem [resolvable:$true] %s161_s18 }
  0x19   : > { %p642_p8 = pnand %p372_p6, %p36_p2  ;;  %s150_s22 = scalar_lea.sflag [#allocation3], %s149_s5 }
  0x1a   : > { %s443_s23 = sshra.s32 %s160_s16, 4  ;;  %s450_s28 = scalar_lea.hbm %s707_s0, 16  ;;  %s444_s23 = int_to_ptr.hbm [resolvable:$true] %s443_s23 }
  0x1b   : > { %s445_s24 = scalar_lea.hbm %s444_s23, 8  ;;  %p447_p9 = pneg %p642_p8 }
  0x1c   : > { %p446_p7 = scmp.ne.s32.totalorder %s444_s23, %s445_s24  ;;  %p451_p0 = scmp.lt.s32.totalorder %s444_s23, %s707_s0 }
  0x1d   : > { %p452_p2 = scmp.lt.s32.totalorder %s450_s28, %s445_s24 }
  0x1e   : > { %p448_p10 = pnand %p447_p9, %p446_p7 }
  0x1f   : > { %p453_p6 = por %p452_p2, %p451_p0 }
  0x20   : > { %p449_p11 = pneg %p448_p10 }
  0x22   : > { %p454_p5 = pnand %p453_p6, %p449_p11 }
  0x24   : > { %457 = shalt.err (!%p454_p5)
}
  0x25   : > { %366 = dma.hbm_to_vmem [thread:$0]  (!%p642_p8), %s160_s16, 128, %s162_s18, %s150_s22  }
  0x26   : > { %170 = sbr.rel (%p597_p3) target bundleno = 192 (0xc0), region = 32  ;;  %s659_s5 = sand.u32 (!%p597_p3), 1, %s535_s13  }
  0x27   : > { %s343_s9 = sshll.u32 (!%p597_p3), %s659_s5, 3  ;;  %s173_s10 = scalar_lea.sflag (!%p597_p3), [#allocation3], %s659_s5 }
  0x28   : > { %s176_s11 = scalar_lea.vmem (!%p597_p3), [#allocation2], %s343_s9 }
  0x2b   : > { %518 = dma.done.wait (%p624_p12), %s173_s10, 128  }
  0x2c   : > { %520 = vsyncadd (%p624_p12), %s173_s10, 4294967168 }
  0x2d   : > { %522 = dma.done.wait (%p41_p1), [#allocation6], 512  }
  0x2e   : > { %524 = vsyncadd (%p41_p1), [#allocation6], 4294966784  ;;  %v209_v0 = vld [vmem:[#allocation5 + $0x18] sm:$0xff]  ;;  %v208_v1 = vld [vmem:[#allocation5 + $0x10] sm:$0xff]  ;;  %vm214_vm0 = vcmask 261120   ;;  %s348_s16 = sshll.u32 %s592_s19, 3 }
  0x2f   : > { %230 = vmatpush.msra.mxu0 %v209_v0  ;;  %v207_v2 = vld [vmem:[#allocation5 + $0x8] sm:$0xff]  ;;  %v206_v3 = vld [vmem:[#allocation5] sm:$0xff]  ;;  %v205_v4 = vld [vmem:[%s176_s11] sm:$0xff]  ;;  %s251_s21 = scalar_lea.hbm %s710_s3, %s348_s16  ;;  %s204_s22 = scalar_lea.vmem [#allocation7], %s343_s9 }
  0x30   : > { %v410_v5 = vld [vmem:[%s709_s2] ss:$0 sm:$0xff]  ;;  %s253_s23 = sshll.u32 %s204_s22, 4  ;;  %s255_s24 = sshll.u32 %s251_s21, 4  ;;  %s254_s23 = int_to_ptr.vmem [resolvable:$true] %s253_s23  ;;  %s256_s24 = int_to_ptr.hbm [resolvable:$true] %s255_s24 }
  0x31   : > { %231 = vmatpush.msra.mxu0 %v208_v1  ;;  %s241_s25 = scalar_lea.sflag [#allocation4], %s659_s5  ;;  %s487_s27 = sshra.s32 %s256_s24, 4  ;;  %s488_s27 = int_to_ptr.hbm [resolvable:$true] %s487_s27 }
  0x32   : > { %s489_s28 = scalar_lea.hbm %s488_s27, 8  ;;  %s493_s8 = scalar_lea.hbm %s710_s3, 16 }
  0x33   : > { %232 = vmatpush.msra.mxu0 %v207_v2  ;;  %p490_p1 = scmp.ne.s32.totalorder %s488_s27, %s489_s28  ;;  %p494_p12 = scmp.lt.s32.totalorder %s488_s27, %s710_s3 }
  0x34   : > { %p495_p8 = scmp.lt.s32.totalorder %s493_s8, %s489_s28 }
  0x35   : > { %233 = vmatpush.msra.mxu0 %v206_v3  ;;  %p491_p3 = pnand %p490_p1, %p628_p13 }
  0x36   : > { %346 = vmatmul.msk.f32.vlgmr.msra.gmra.mxu0 %vm214_vm0, %v205_v4  ;;  %p496_p7 = por %p495_p8, %p494_p12 }
  0x37   : > { %p492_p5 = pneg %p491_p3 }
  0x39   : > { %p497_p9 = pnand %p496_p7, %p492_p5 }
  0xb3   : > { %v235_v6 = vpop.f32.mrf.mxu0 }
  0xb4   : > { %v236_v7 = vadd.f32 %v410_v5, %v235_v6 }
  0xb6   : > { %411 = vtanh.f32 %v236_v7 }
  0xbc   : > { %v412_v8 = vpop.eup %411 }
  0xbd   : > { %239 = vst [vmem:[%s204_s22] sm:$0xff] %v412_v8 }
  0xbe   : > { %500 = shalt.err (!%p497_p9)
}
  0xbf   : > { %357 = dma.vmem_to_hbm [thread:$0]  (%p628_p13), %s254_s23, 128, %s256_s24, %s241_s25  }
  0xc0 PF: > { %s267_s5 = sand.u32 1, %s531_s12   ;;  %p716_p10 = scmp.ge.s32.totalorder %s543_s15, 2 }
  0xc1   : > { %s268_s11 = scalar_lea.sflag [#allocation4], %s267_s5 }
  0xc2   : > { %p368_p11 = pnand %p716_p10, %p633_p4 }
  0xc4   : > { %p369_p0 = pneg %p368_p11 }
  0xc6   : > { %526 = dma.done.wait (%p369_p0), %s268_s11, 128  }
  0xc7   : > { %528 = vsyncadd (%p369_p0), %s268_s11, 4294967168  ;;  %p17_p2 = scmp.ge.s32.totalorder %s608_s26, 4   ;;  %s717_s12 = smov %s535_s13 }
  0xc8   : > { %s718_s13 = smov %s539_s14  ;;  %s719_s14 = smov %s620_s29 }
  0xc9   : > { %s720_s15 = smov %s608_s26  ;;  %19 = sbr.rel (!%p17_p2) target bundleno = 6 (0x6), region = 81 }
  0xce   :  { %274 = vsyncpa [#allocation3], 1 }
  0xcf   :  { %276 = vsyncpa [#allocation3 + $0x1], 1 }
  0xd0   :  { %277 = vsyncpa [#allocation6], 1 }
  0xd1   :  { %278 = vsyncpa [#allocation4], 1 }
  0xd2   :  { %280 = vsyncpa [#allocation4 + $0x1], 1 }

</bundles_post_ra>
